<compile_context>
chip_gen: v6e
topology: v6e:2x2x1
jax: 0.10.0
libtpu: 0.0.40
codegen_flags: <defaults>
</compile_context>

<pallas_src>
import functools

import jax
import jax.numpy as jnp
from jax.experimental import pallas as pl
from jax.experimental.pallas import tpu as pltpu

_LANE = 128
_SUB = 8


def _round_up(x, m):
    return (x + m - 1) // m * m


def mlp_kernel(x_ref, w1_ref, b1_ref, w2_ref, b2_ref, w3_ref, b3_ref, o_ref):
    """Three MXU matmuls (f32 accumulation), bias + ReLU fused on the VPU."""
    x = x_ref[...]                                                # (tile_b, id_p) bf16
    h1 = jnp.dot(x, w1_ref[...], preferred_element_type=jnp.float32) + b1_ref[...]
    h1 = jnp.maximum(h1, 0.0).astype(w2_ref.dtype)
    h2 = jnp.dot(h1, w2_ref[...], preferred_element_type=jnp.float32) + b2_ref[...]
    h2 = jnp.maximum(h2, 0.0).astype(w3_ref.dtype)
    out = jnp.dot(h2, w3_ref[...], preferred_element_type=jnp.float32) + b3_ref[...]
    o_ref[...] = out.astype(o_ref.dtype)


def prepare_params(params, compute_dtype=jnp.bfloat16):
    """One-time param prep (hoisted out of the per-call path): zero-pad feature
    dims to 128 lanes and cast weights to the MXU compute dtype."""
    cd = compute_dtype
    id_dim, unit = params["W1"].shape
    od = params["W3"].shape[1]
    id_p, unit_p, od_p = (_round_up(d, _LANE) for d in (id_dim, unit, od))

    def pad_w(w, rp, cp):
        r, c = w.shape
        return jnp.pad(w.astype(cd), ((0, rp - r), (0, cp - c)))

    def pad_b(b, cp):
        b = b.astype(jnp.float32).reshape(1, -1)
        return jnp.pad(b, ((0, 0), (0, cp - b.shape[-1])))

    return {
        "W1": pad_w(params["W1"], id_p, unit_p),
        "b1": pad_b(params["b1"], unit_p),
        "W2": pad_w(params["W2"], unit_p, unit_p),
        "b2": pad_b(params["b2"], unit_p),
        "W3": pad_w(params["W3"], unit_p, od_p),
        "b3": pad_b(params["b3"], od_p),
    }


def _choose_tile_b(batch, cap):
    """Batch tile: multiple of 8, <= cap, >=2 grid steps when possible (so the
    parallel axis can shard across v7x's two TCs), and ~Bp/nsteps so unlucky
    batch sizes don't pad ~2x."""
    bp8 = _round_up(max(batch, 1), _SUB)
    if bp8 < 2 * _SUB:
        return bp8, bp8
    nsteps = max(2, pl.cdiv(bp8, cap))
    tile_b = _round_up(pl.cdiv(bp8, nsteps), _SUB)
    bp = _round_up(bp8, tile_b)
    return tile_b, bp


def _resident_spec(shape):
    """BlockSpec for an operand that stays resident across the batch grid.
    Constant index_map -> single-buffer it (double buffering buys nothing)."""
    try:
        return pl.BlockSpec(shape, lambda i: (0, 0), pipeline_mode=pl.Buffered(1))
    except (AttributeError, TypeError):  # older jax without pipeline_mode
        return pl.BlockSpec(shape, lambda i: (0, 0))


def simple_network_forward(x, padded_params, od, *, out_dtype=jnp.float32):
    """x: (B, id) f32. padded_params: output of prepare_params. od: true out dim."""
    p = padded_params
    B, id_dim = x.shape
    id_p, unit_p = p["W1"].shape
    od_p = p["W3"].shape[1]
    cd = p["W1"].dtype
    isz = jnp.dtype(cd).itemsize
    osz = jnp.dtype(out_dtype).itemsize

    # Single-buffered resident weight footprint decides the batch-tile ceiling.
    weight_bytes = isz * (id_p * unit_p + unit_p * unit_p + unit_p * od_p)
    weight_bytes += 4 * (2 * unit_p + od_p)                      # f32 biases
    if weight_bytes <= (8 << 20):
        cap = 1024
    elif weight_bytes <= (32 << 20):
        cap = 512
    else:
        cap = 256
    tile_b, Bp = _choose_tile_b(B, cap)
    grid = (Bp // tile_b,)

    # Pad x (fuses under jit); zero padding is exact for Linear + ReLU.
    xp = jnp.pad(x.astype(cd), ((0, Bp - B), (0, id_p - id_dim)))

    in_specs = [
        pl.BlockSpec((tile_b, id_p), lambda i: (i, 0)),          # x tile (pipelined)
        _resident_spec((id_p, unit_p)),                          # W1 (resident)
        _resident_spec((1, unit_p)),                             # b1
        _resident_spec((unit_p, unit_p)),                        # W2
        _resident_spec((1, unit_p)),                             # b2
        _resident_spec((unit_p, od_p)),                          # W3
        _resident_spec((1, od_p)),                               # b3
    ]
    out_spec = pl.BlockSpec((tile_b, od_p), lambda i: (i, 0))

    # Always set the scoped-VMEM limit (v5e default is only 16 MiB); cap at
    # 52 MiB to keep headroom on v7x (64 MiB/TC) for I/O buffers + scratch.
    # TODO(synk): if weights ever exceed ~40 MiB single-buffered, tile W2 over
    # a K/N reduction grid axis with an accumulator instead of keeping it resident.
    resident = weight_bytes + 2 * tile_b * (isz * id_p + osz * od_p)
    vmem_limit = int(min(max(resident + (4 << 20), 32 << 20), 52 << 20))

    out = pl.pallas_call(
        mlp_kernel,
        out_shape=jax.ShapeDtypeStruct((Bp, od_p), out_dtype),
        grid_spec=pltpu.PrefetchScalarGridSpec(
            num_scalar_prefetch=0,
            grid=grid,
            in_specs=in_specs,
            out_specs=out_spec,
        ),
        compiler_params=pltpu.CompilerParams(
            dimension_semantics=("parallel",),
            vmem_limit_bytes=vmem_limit,
        ),
    )(xp, p["W1"], p["b1"], p["W2"], p["b2"], p["W3"], p["b3"])

    return out[:B, :od]


def init_params(key, id_dim, unit, od):
    """Deterministic synthetic init matching nn.Linear shapes (stored transposed)."""
    ks = jax.random.split(key, 6)

    def linear(kw, kb, fan_in, fan_out):
        bound = 1.0 / jnp.sqrt(fan_in)
        # PyTorch weight is (out, in); we store (in, out) so the kernel does x @ W.
        W = jax.random.uniform(kw, (fan_in, fan_out), jnp.float32, -bound, bound)
        b = jax.random.uniform(kb, (1, fan_out), jnp.float32, -bound, bound)
        return W, b

    W1, b1 = linear(ks[0], ks[1], id_dim, unit)
    W2, b2 = linear(ks[2], ks[3], unit, unit)
    W3, b3 = linear(ks[4], ks[5], unit, od)
    return {"W1": W1, "b1": b1, "W2": W2, "b2": b2, "W3": W3, "b3": b3}


def reference_forward(x, p, compute_dtype=jnp.bfloat16):
    """Pure-JAX reference with the same bf16 rounding of inputs/weights/activations."""
    cd = compute_dtype
    q = lambda a: a.astype(cd).astype(jnp.float32)
    h = jnp.maximum(q(x) @ q(p["W1"]) + p["b1"], 0.0)
    h = jnp.maximum(q(h) @ q(p["W2"]) + p["b2"], 0.0)
    return q(h) @ q(p["W3"]) + p["b3"]


if __name__ == "__main__":
    key = jax.random.PRNGKey(0)
    k_x, k_p = jax.random.split(key)

    B, ID, UNIT, OD = 16, 32, 64, 16
    x = jax.random.normal(k_x, (B, ID), dtype=jnp.float32)
    params = init_params(k_p, ID, UNIT, OD)

    padded = prepare_params(params)                    # one-time weight prep
    fwd = jax.jit(functools.partial(simple_network_forward, od=OD))

    out = jax.block_until_ready(fwd(x, padded))
    ref = reference_forward(x, params)

    assert out.shape == (B, OD), out.shape
    assert jnp.allclose(out, ref, atol=2e-3, rtol=2e-3), "mismatch vs reference"

    print("KERNEL_OK")
</pallas_src>

<mosaic_0001>
module attributes {stable_mosaic.version = 11 : i64} {
  func.func @mlp_kernel(%arg0: i32, %arg1: memref<8x128xbf16, #tpu.memory_space<vmem>>, %arg2: memref<128x128xbf16, #tpu.memory_space<vmem>>, %arg3: memref<1x128xf32, #tpu.memory_space<vmem>>, %arg4: memref<128x128xbf16, #tpu.memory_space<vmem>>, %arg5: memref<1x128xf32, #tpu.memory_space<vmem>>, %arg6: memref<128x128xbf16, #tpu.memory_space<vmem>>, %arg7: memref<1x128xf32, #tpu.memory_space<vmem>>, %arg8: memref<8x128xf32, #tpu.memory_space<vmem>>) attributes {dimension_semantics = [#tpu.dimension_semantics<parallel>], iteration_bounds = array<i64: 2>, scalar_prefetch = 0 : i64, scratch_operands = 0 : i64, tpu.core_type = #tpu.core_type<tc>, window_params = [{transform_indices = @transform_0, window_bounds = array<i64: 8, 128>}, {pipeline_mode = #tpu.pipeline_mode<synchronous>, transform_indices = @transform_1, window_bounds = array<i64: 128, 128>}, {pipeline_mode = #tpu.pipeline_mode<synchronous>, transform_indices = @transform_2, window_bounds = array<i64: 1, 128>}, {pipeline_mode = #tpu.pipeline_mode<synchronous>, transform_indices = @transform_3, window_bounds = array<i64: 128, 128>}, {pipeline_mode = #tpu.pipeline_mode<synchronous>, transform_indices = @transform_4, window_bounds = array<i64: 1, 128>}, {pipeline_mode = #tpu.pipeline_mode<synchronous>, transform_indices = @transform_5, window_bounds = array<i64: 128, 128>}, {pipeline_mode = #tpu.pipeline_mode<synchronous>, transform_indices = @transform_6, window_bounds = array<i64: 1, 128>}, {transform_indices = @transform_7, window_bounds = array<i64: 8, 128>}]} {
    %c0 = arith.constant 0 : index
    %c0_0 = arith.constant 0 : index
    %0 = vector.load %arg1[%c0, %c0_0] : memref<8x128xbf16, #tpu.memory_space<vmem>>, vector<8x128xbf16>
    %c0_1 = arith.constant 0 : index
    %c0_2 = arith.constant 0 : index
    %1 = vector.load %arg2[%c0_1, %c0_2] : memref<128x128xbf16, #tpu.memory_space<vmem>>, vector<128x128xbf16>
    %cst = arith.constant dense<0.000000e+00> : vector<8x128xf32>
    %2 = tpu.matmul %0, %1, %cst {dimension_numbers = #tpu.dot_dimension_numbers<[1], [0], [0], [1], [0, 0, 1, 1], [], []>} : vector<8x128xbf16>, vector<128x128xbf16>, vector<8x128xf32> -> vector<8x128xf32>
    %c0_3 = arith.constant 0 : index
    %c0_4 = arith.constant 0 : index
    %3 = vector.load %arg3[%c0_3, %c0_4] : memref<1x128xf32, #tpu.memory_space<vmem>>, vector<1x128xf32>
    %4 = vector.broadcast %3 : vector<1x128xf32> to vector<8x128xf32>
    %5 = arith.addf %2, %4 : vector<8x128xf32>
    %cst_5 = arith.constant 0.000000e+00 : f32
    %6 = vector.broadcast %cst_5 : f32 to vector<8x128xf32>
    %7 = arith.maximumf %5, %6 : vector<8x128xf32>
    %8 = arith.truncf %7 : vector<8x128xf32> to vector<8x128xbf16>
    %c0_6 = arith.constant 0 : index
    %c0_7 = arith.constant 0 : index
    %9 = vector.load %arg4[%c0_6, %c0_7] : memref<128x128xbf16, #tpu.memory_space<vmem>>, vector<128x128xbf16>
    %cst_8 = arith.constant dense<0.000000e+00> : vector<8x128xf32>
    %10 = tpu.matmul %8, %9, %cst_8 {dimension_numbers = #tpu.dot_dimension_numbers<[1], [0], [0], [1], [0, 0, 1, 1], [], []>} : vector<8x128xbf16>, vector<128x128xbf16>, vector<8x128xf32> -> vector<8x128xf32>
    %c0_9 = arith.constant 0 : index
    %c0_10 = arith.constant 0 : index
    %11 = vector.load %arg5[%c0_9, %c0_10] : memref<1x128xf32, #tpu.memory_space<vmem>>, vector<1x128xf32>
    %12 = vector.broadcast %11 : vector<1x128xf32> to vector<8x128xf32>
    %13 = arith.addf %10, %12 : vector<8x128xf32>
    %cst_11 = arith.constant 0.000000e+00 : f32
    %14 = vector.broadcast %cst_11 : f32 to vector<8x128xf32>
    %15 = arith.maximumf %13, %14 : vector<8x128xf32>
    %16 = arith.truncf %15 : vector<8x128xf32> to vector<8x128xbf16>
    %c0_12 = arith.constant 0 : index
    %c0_13 = arith.constant 0 : index
    %17 = vector.load %arg6[%c0_12, %c0_13] : memref<128x128xbf16, #tpu.memory_space<vmem>>, vector<128x128xbf16>
    %cst_14 = arith.constant dense<0.000000e+00> : vector<8x128xf32>
    %18 = tpu.matmul %16, %17, %cst_14 {dimension_numbers = #tpu.dot_dimension_numbers<[1], [0], [0], [1], [0, 0, 1, 1], [], []>} : vector<8x128xbf16>, vector<128x128xbf16>, vector<8x128xf32> -> vector<8x128xf32>
    %c0_15 = arith.constant 0 : index
    %c0_16 = arith.constant 0 : index
    %19 = vector.load %arg7[%c0_15, %c0_16] : memref<1x128xf32, #tpu.memory_space<vmem>>, vector<1x128xf32>
    %20 = vector.broadcast %19 : vector<1x128xf32> to vector<8x128xf32>
    %21 = arith.addf %18, %20 : vector<8x128xf32>
    %c0_17 = arith.constant 0 : index
    %c0_18 = arith.constant 0 : index
    %22 = vector.load %arg8[%c0_17, %c0_18] : memref<8x128xf32, #tpu.memory_space<vmem>>, vector<8x128xf32>
    tpu.vector_store %arg8[%c0_17, %c0_18], %21 {strides = array<i32>} : memref<8x128xf32, #tpu.memory_space<vmem>>, vector<8x128xf32>,
    return
  }
  func.func @transform_0(%arg0: i32) -> (i32, i32) {
    %c0_i32 = arith.constant 0 : i32
    %c0_i32_0 = arith.constant 0 : i32
    return %arg0, %c0_i32 : i32, i32
  }
  func.func @transform_1(%arg0: i32) -> (i32, i32) {
    %c0_i32 = arith.constant 0 : i32
    %c0_i32_0 = arith.constant 0 : i32
    %c0_i32_1 = arith.constant 0 : i32
    return %c0_i32, %c0_i32_0 : i32, i32
  }
  func.func @transform_2(%arg0: i32) -> (i32, i32) {
    %c0_i32 = arith.constant 0 : i32
    %c0_i32_0 = arith.constant 0 : i32
    %c0_i32_1 = arith.constant 0 : i32
    return %c0_i32, %c0_i32_0 : i32, i32
  }
  func.func @transform_3(%arg0: i32) -> (i32, i32) {
    %c0_i32 = arith.constant 0 : i32
    %c0_i32_0 = arith.constant 0 : i32
    %c0_i32_1 = arith.constant 0 : i32
    return %c0_i32, %c0_i32_0 : i32, i32
  }
  func.func @transform_4(%arg0: i32) -> (i32, i32) {
    %c0_i32 = arith.constant 0 : i32
    %c0_i32_0 = arith.constant 0 : i32
    %c0_i32_1 = arith.constant 0 : i32
    return %c0_i32, %c0_i32_0 : i32, i32
  }
  func.func @transform_5(%arg0: i32) -> (i32, i32) {
    %c0_i32 = arith.constant 0 : i32
    %c0_i32_0 = arith.constant 0 : i32
    %c0_i32_1 = arith.constant 0 : i32
    return %c0_i32, %c0_i32_0 : i32, i32
  }
  func.func @transform_6(%arg0: i32) -> (i32, i32) {
    %c0_i32 = arith.constant 0 : i32
    %c0_i32_0 = arith.constant 0 : i32
    %c0_i32_1 = arith.constant 0 : i32
    return %c0_i32, %c0_i32_0 : i32, i32
  }
  func.func @transform_7(%arg0: i32) -> (i32, i32) {
    %c0_i32 = arith.constant 0 : i32
    %c0_i32_0 = arith.constant 0 : i32
    return %arg0, %c0_i32 : i32, i32
  }
}

</mosaic_0001>

<bundles_post_ra>
// kernel: simple_network_forward.1
= control target key start
LH: loop header
LB: loop body
LE: loop exit
PB: predicated region body
PF: predicated region fallthrough
CT: control target
= control target key end

     0   :  { %12 = vsyncpa [#allocation3], 0  ;;  %s1373_s0 = inlined_call_operand.vmem [shape: bf16[16,128], index: 0, kind: input, shape index: {}]   ;;  %s1374_s1 = inlined_call_operand.hbm [shape: bf16[128,128], index: 1, kind: input, shape index: {}]   ;;  %s1375_s2 = inlined_call_operand.vmem [shape: f32[1,128], index: 2, kind: input, shape index: {}]   ;;  %s1376_s3 = inlined_call_operand.hbm [shape: bf16[128,128], index: 3, kind: input, shape index: {}]   ;;  %s1377_s4 = inlined_call_operand.vmem [shape: f32[1,128], index: 4, kind: input, shape index: {}]   ;;  %s1378_s5 = inlined_call_operand.hbm [shape: bf16[128,128], index: 5, kind: input, shape index: {}]   ;;  %s1379_s6 = inlined_call_operand.vmem [shape: f32[1,128], index: 6, kind: input, shape index: {}]   ;;  %s1380_s7 = inlined_call_operand.hbm [shape: f32[16,128], index: 7, kind: output, shape index: {}]  }
   0x1   :  { %13 = vsyncpa [#allocation6], 0 }
   0x2   :  { %14 = vsyncpa [#allocation4], 0 }
   0x3   :  { %16 = vsyncpa [#allocation4 + $0x1], 0  ;;  %s1186_s24 = smov 0   ;;  %s1188_s25 = smov 0  }
   0x4   :  { %s1190_s26 = smov 0   ;;  %s1192_s27 = smov 0  }
   0x5 LB: > { %s1207_s28 = sadd.s32 4294967295, %s1136_s27   ;;  %s762_s29 = sadd.s32 4294967294, %s1136_s27   ;;  %s1136_s27 = sphi %s1192_s27, %s1396_s27   ;;  %s1132_s26 = sphi %s1190_s26, %s1395_s26   ;;  %s1128_s25 = sphi %s1188_s25, %s1394_s25   ;;  %s1124_s24 = sphi %s1186_s24, %s1393_s24  }
   0x6   : > { %s1211_s30 = sadd.s32 1, %s1136_s27   ;;  %s181_s8 = sadd.s32 1, %s1132_s26 }
   0x7   : > { %s178_s9 = ssub.s32 %s1136_s27, %s1211_s30  ;;  %p191_p0 = scmp.ne.s32.totalorder %s1132_s26, %s1128_s25 }
   0x8   : > { %p179_p1 = scmp.eq.s32.totalorder %s178_s9, 0  ;;  %p192_p2 = scmp.eq.s32.totalorder %s1207_s28, 1 }
   0x9   : > { %p197_p3 = scmp.ne.s32.totalorder %s1128_s25, %s1124_s24  ;;  %p198_p4 = scmp.eq.s32.totalorder %s762_s29, 1 }
   0xa   : > { %s1222_s10 = scalar_select %p179_p1, %s1132_s26, %s181_s8  }
   0xb   : > { %p1224_p5 = por %p192_p2, %p191_p0  ;;  %p1228_p6 = por %p198_p4, %p197_p3 }
   0xc   : > { %p763_p7 = scmp.ge.s32.totalorder %s1136_s27, 1  ;;  %p205_p8 = scmp.lt.s32.totalorder %s1136_s27, 3 }
   0xd   : > { %s1383_s11 = scalar_select %p1224_p5, 1, 0 }
   0xe   : > { %s1384_s12 = scalar_select %p1228_p6, 1, 0 }
   0xf   : > { %p1381_p9 = scmp.eq.s32.totalorder %s1207_s28, 0  ;;  %p1235_p10 = pnand %p763_p7, %p205_p8 }
  0x10   : > { %s1138_s14 = smov [#allocation5]   ;;  %s1139_s17 = smov [#allocation2]  }
  0x11   : > { %p906_p11 = pneg %p1235_p10  ;;  %s233_s15 = sshll.u32 %s1138_s14, 4  ;;  %s234_s15 = int_to_ptr.vmem [resolvable:$true] %s233_s15 }
  0x12   : > { %s217_s18 = sshll.u32 %s1139_s17, 4  ;;  %s1140_s19 = smov [#allocation7]   ;;  %s218_s18 = int_to_ptr.vmem [resolvable:$true] %s217_s18 }
  0x13   : > { %p1243_p12 = pnand %p1381_p9, %p906_p11  ;;  %s249_s20 = sshll.u32 %s1140_s19, 4  ;;  %s250_s20 = int_to_ptr.vmem [resolvable:$true] %s249_s20 }
  0x14   : > { %s1001_s21 = scalar_lea.vmem %s234_s15, 1024  ;;  %p1009_p3 = scmp.lt.s32.totalorder %s234_s15, %s234_s15 }
  0x15   : > { %p992_p13 = pneg %p1243_p12  ;;  %p1002_p0 = scmp.ne.s32.totalorder %s234_s15, %s1001_s21 }
  0x16   : > { %p1010_p4 = scmp.lt.s32.totalorder %s1001_s21, %s1001_s21 }
  0x17   : > { %p1004_p1 = pnand %p1002_p0, %p992_p13 }
  0x18   : > { %p1011_p7 = por %p1010_p4, %p1009_p3 }
  0x19   : > { %p1005_p2 = pneg %p1004_p1 }
  0x1b   : > { %p1012_p8 = pnand %p1011_p7, %p1005_p2 }
  0x1d   : > { %1015 = shalt.err (!%p1012_p8)
}
  0x1e   : > { %s1141_s22 = smov 64   ;;  %s1142_s23 = smov 4  }
  0x1f   : > { %912 = dma.hbm_to_vmem [thread:$0]  (!%p1243_p12), %s1376_s3, 1024, %s234_s15, [#allocation6], %s1141_s22, %s1141_s22, %s1142_s23  }
  0x20   : > { %s1027_s9 = scalar_lea.vmem %s218_s18, 1024  ;;  %p1035_p9 = scmp.lt.s32.totalorder %s218_s18, %s218_s18 }
  0x21   : > { %p1028_p11 = scmp.ne.s32.totalorder %s218_s18, %s1027_s9  ;;  %p1036_p6 = scmp.lt.s32.totalorder %s1027_s9, %s1027_s9 }
  0x23   : > { %p1030_p0 = pnand %p1028_p11, %p992_p13  ;;  %p1037_p3 = por %p1036_p6, %p1035_p9 }
  0x25   : > { %p1031_p1 = pneg %p1030_p0 }
  0x27   : > { %p1038_p2 = pnand %p1037_p3, %p1031_p1 }
  0x29   : > { %1041 = shalt.err (!%p1038_p2)
}
  0x2a   : > { %909 = dma.hbm_to_vmem [thread:$0]  (!%p1243_p12), %s1374_s1, 1024, %s218_s18, [#allocation3], %s1141_s22, %s1141_s22, %s1142_s23  }
  0x2b   : > { %s1053_s15 = scalar_lea.vmem %s250_s20, 1024  ;;  %p1061_p11 = scmp.lt.s32.totalorder %s250_s20, %s250_s20 }
  0x2c   : > { %p1054_p4 = scmp.ne.s32.totalorder %s250_s20, %s1053_s15  ;;  %p1062_p0 = scmp.lt.s32.totalorder %s1053_s15, %s1053_s15 }
  0x2e   : > { %p1056_p7 = pnand %p1054_p4, %p992_p13  ;;  %p1063_p5 = por %p1062_p0, %p1061_p11 }
  0x30   : > { %p1057_p8 = pneg %p1056_p7 }
  0x32   : > { %p1064_p6 = pnand %p1063_p5, %p1057_p8 }
  0x34   : > { %1067 = shalt.err (!%p1064_p6)
}
  0x35   : > { %915 = dma.hbm_to_vmem [thread:$0]  (!%p1243_p12), %s1378_s5, 1024, %s250_s20, [#allocation6], %s1141_s22, %s1141_s22, %s1142_s23  }
  0x36   : > { %275 = sbr.rel (%p1235_p10) target bundleno = 704 (0x2c0), region = 48  ;;  %p1387_p9 = scmp.eq.s32.totalorder (!%p1235_p10), %s1207_s28, 0 }
  0x3b   : > { %1111 = dma.done.wait (%p1387_p9), [#allocation3], 1024   ;;  %p1388_p13 = pmov %p1387_p9 }
  0x3c   : > { %p1389_p1 = pmov %p1387_p9 }
  0x3d   : > { %1113 = vsyncadd (%p1388_p13), [#allocation3], 4294966272 }
  0x3e   : > { %1115 = dma.done.wait (%p1389_p1), [#allocation6], 2048   ;;  %p1390_p5 = pmov %p1389_p1 }
  0x3f   : > { %v1143_v0 = vmov 0.0   ;;  %vm1144_vm0 = vmmov 0   ;;  %v966_v1 = vld [vmem:[#allocation2 + $0x38] sm:$0xff]   ;;  %v967_v2 = vld [vmem:[#allocation2 + $0x30] sm:$0xff]   ;;  %v968_v3 = vld [vmem:[#allocation2 + $0x28] sm:$0xff]   ;;  %p314_p10 = scmp.lt.s32.totalorder %s1207_s28, 1 }
  0x40   : > { %1117 = vsyncadd (%p1390_p5), [#allocation6], 4294965248  ;;  %832 = vmatprep.subr.bf16.mxu0 %v1143_v0  ;;  %848 = vmatprep.mubr.msk.bf16.mxu0 %vm1144_vm0, %v1143_v0  ;;  %v974_v4 = vld [vmem:[#allocation5 + $0x38] sm:$0xff]   ;;  %v969_v5 = vld [vmem:[#allocation2 + $0x20] sm:$0xff]   ;;  %s311_s14 = sand.u32 1, %s1128_s25   ;;  %s802_s21 = sshll.u32 %s1207_s28, 7 }
  0x41   : > { %852 = vmatprep.subr.bf16.mxu1 %v1143_v0  ;;  %868 = vmatprep.mubr.msk.bf16.mxu1 %vm1144_vm0, %v1143_v0  ;;  %v975_v6 = vld [vmem:[#allocation5 + $0x30] sm:$0xff]   ;;  %v970_v7 = vld [vmem:[#allocation2 + $0x18] sm:$0xff]   ;;  %s315_s13 = scalar_select %p314_p10, %s1207_s28, 1  ;;  %v976_v8 = vld [vmem:[#allocation5 + $0x28] sm:$0xff]  }
  0x42   : > { %833 = vmatpush3.bf16.msra.mxu0 %v966_v1  ;;  %853 = vmatpush3.bf16.msra.mxu1 %v974_v4  ;;  %v971_v9 = vld [vmem:[#allocation2 + $0x10] sm:$0xff]   ;;  %v977_v10 = vld [vmem:[#allocation5 + $0x20] sm:$0xff]   ;;  %v972_v11 = vld [vmem:[#allocation2 + $0x8] sm:$0xff]   ;;  %s772_s17 = sshll.u32 %s311_s14, 3  ;;  %s659_s23 = scalar_lea.sflag [#allocation4], %s311_s14 }
  0x43   : > { %834 = vmatprep.subr.bf16.mxu0 %v1143_v0  ;;  %854 = vmatprep.subr.bf16.mxu1 %v1143_v0  ;;  %v978_v12 = vld [vmem:[#allocation5 + $0x18] sm:$0xff]   ;;  %s773_s16 = sshll.u32 %s315_s13, 2  ;;  %v973_v13 = vld [vmem:[#allocation2] sm:$0xff]   ;;  %v979_v14 = vld [vmem:[#allocation5 + $0x10] sm:$0xff]   ;;  %s313_s13 = scalar_lea.vmem [#allocation8], %s772_s17 }
  0x44   : > { %s317_s22 = scalar_lea.vmem %s1373_s0, %s773_s16  ;;  %v980_v16 = vld [vmem:[#allocation5 + $0x8] sm:$0xff]   ;;  %v981_v17 = vld [vmem:[#allocation5] sm:$0xff]   ;;  %v982_v18 = vld [vmem:[#allocation7 + $0x38] sm:$0xff]   ;;  %s672_s16 = sshll.u32 %s313_s13, 4  ;;  %s1334_s16 = int_to_ptr.vmem [resolvable:$true] %s672_s16 }
  0x45   : > { %v319_v15 = vld [vmem:[%s317_s22] sm:$0xf]  ;;  %v983_v19 = vld [vmem:[#allocation7 + $0x30] sm:$0xff]   ;;  %v984_v20 = vld [vmem:[#allocation7 + $0x28] sm:$0xff]   ;;  %s1332_s22 = scalar_lea.hbm %s1380_s7, %s802_s21  ;;  %s1068_s29 = scalar_lea.vmem %s1334_s16, 128 }
  0x46   : > { %835 = vmatpush3.bf16.msra.mxu0 %v967_v2  ;;  %855 = vmatpush3.bf16.msra.mxu1 %v975_v6  ;;  %v985_v21 = vld [vmem:[#allocation7 + $0x20] sm:$0xff]   ;;  %v986_v22 = vld [vmem:[#allocation7 + $0x18] sm:$0xff]   ;;  %v987_v23 = vld [vmem:[#allocation7 + $0x10] sm:$0xff]   ;;  %p1069_p12 = scmp.ne.s32.totalorder %s1334_s16, %s1068_s29  ;;  %p1391_p3 = scmp.ne.s32.totalorder %s1383_s11, 0 }
  0x47   : > { %836 = vmatprep.subr.bf16.mxu0 %v1143_v0  ;;  %856 = vmatprep.subr.bf16.mxu1 %v1143_v0  ;;  %v774_v24 = vld [vmem:[%s1375_s2] ss:$0 sm:$0xff]  ;;  %v988_v32 = vld [vmem:[#allocation7 + $0x8] sm:$0xff]   ;;  %s1145_s28 = smov [#allocation8]  }
  0x48   : > { %v989_v33 = vld [vmem:[#allocation7] sm:$0xff]   ;;  %p1070_p2 = pnand %p1069_p12, %p1391_p3  ;;  %s1072_s8 = sshll.u32 %s1145_s28, 4  ;;  %s1073_s8 = int_to_ptr.vmem [resolvable:$false] %s1072_s8 }
  0x49   : > { %v783_v34 = vld [vmem:[%s1377_s4] ss:$0 sm:$0xff]  ;;  %s1074_s9 = scalar_lea.vmem %s1073_s8, 256  ;;  %p1075_p7 = scmp.lt.s32.totalorder %s1334_s16, %s1073_s8 }
  0x4a   : > { %837 = vmatpush3.bf16.msra.mxu0 %v968_v3  ;;  %857 = vmatpush3.bf16.msra.mxu1 %v976_v8  ;;  %v792_v42 = vld [vmem:[%s1379_s6] ss:$0 sm:$0xff]  ;;  %p1071_p4 = pneg %p1070_p2  ;;  %p1076_p8 = scmp.lt.s32.totalorder %s1074_s9, %s1068_s29 }
  0x4b   : > { %838 = vmatprep.subr.bf16.mxu0 %v1143_v0  ;;  %858 = vmatprep.subr.bf16.mxu1 %v1143_v0 }
  0x4c   : > { %p1077_p11 = por %p1076_p8, %p1075_p7 }
  0x4e   : > { %839 = vmatpush3.bf16.msra.mxu0 %v969_v5  ;;  %859 = vmatpush3.bf16.msra.mxu1 %v977_v10  ;;  %p1078_p0 = pnand %p1077_p11, %p1071_p4 }
  0x4f   : > { %840 = vmatprep.subr.bf16.mxu0 %v1143_v0  ;;  %860 = vmatprep.subr.bf16.mxu1 %v1143_v0 }
  0x52   : > { %841 = vmatpush3.bf16.msra.mxu0 %v970_v7  ;;  %861 = vmatpush3.bf16.msra.mxu1 %v978_v12 }
  0x53   : > { %842 = vmatprep.subr.bf16.mxu0 %v1143_v0  ;;  %862 = vmatprep.subr.bf16.mxu1 %v1143_v0 }
  0x56   : > { %843 = vmatpush3.bf16.msra.mxu0 %v971_v9  ;;  %863 = vmatpush3.bf16.msra.mxu1 %v979_v14 }
  0x57   : > { %844 = vmatprep.subr.bf16.mxu0 %v1143_v0  ;;  %864 = vmatprep.subr.bf16.mxu1 %v1143_v0 }
  0x5a   : > { %845 = vmatpush3.bf16.msra.mxu0 %v972_v11  ;;  %865 = vmatpush3.bf16.msra.mxu1 %v980_v16 }
  0x5b   : > { %846 = vmatprep.subr.bf16.mxu0 %v1143_v0  ;;  %866 = vmatprep.subr.bf16.mxu1 %v1143_v0 }
  0x5e   : > { %847 = vmatpush3.bf16.msra.mxu0 %v973_v13  ;;  %867 = vmatpush3.bf16.msra.mxu1 %v981_v17 }
  0x5f   : > { %872 = vmatprep.subr.bf16.mxu0 %v1143_v0 }
  0x61   : > { %849 = vmatmul.mubr.bf16.vlgmr.msra.gmra.mxu0 %v319_v15 }
  0x62   : > { %888 = vmatprep.mubr.msk.bf16.mxu0 %vm1144_vm0, %v1143_v0  ;;  %873 = vmatpush3.bf16.msra.mxu0 %v982_v18 }
  0x63   : > { %874 = vmatprep.subr.bf16.mxu0 %v1143_v0 }
  0x66   : > { %875 = vmatpush3.bf16.msra.mxu0 %v983_v19 }
  0x67   : > { %876 = vmatprep.subr.bf16.mxu0 %v1143_v0 }
  0x6a   : > { %877 = vmatpush3.bf16.msra.mxu0 %v984_v20 }
  0x6b   : > { %878 = vmatprep.subr.bf16.mxu0 %v1143_v0 }
  0x6e   : > { %879 = vmatpush3.bf16.msra.mxu0 %v985_v21 }
  0x6f   : > { %880 = vmatprep.subr.bf16.mxu0 %v1143_v0 }
  0x72   : > { %881 = vmatpush3.bf16.msra.mxu0 %v986_v22 }
  0x73   : > { %882 = vmatprep.subr.bf16.mxu0 %v1143_v0 }
  0x76   : > { %883 = vmatpush3.bf16.msra.mxu0 %v987_v23 }
  0x77   : > { %884 = vmatprep.subr.bf16.mxu0 %v1143_v0 }
  0x7a   : > { %885 = vmatpush3.bf16.msra.mxu0 %v988_v32 }
  0x7b   : > { %886 = vmatprep.subr.bf16.mxu0 %v1143_v0 }
  0x7e   : > { %887 = vmatpush3.bf16.msra.mxu0 %v989_v33 }
 0x121   : > { %v425_v25 = vpop.f32.mrf.mxu0 }
 0x122   : > { %v426_v26 = vadd.f32 %v774_v24, %v425_v25 }
 0x123   : > { %v850_v27 = vpop.f32.mrf.mxu0 }
 0x124   : > { %v431_v28 = vmax.f32 %v426_v26, 0.0 }
 0x125   : > { %v428_v29 = vpop.f32.mrf.mxu0 }
 0x126   : > { %v432_v30 = vpack.c.bf16 %v431_v28, %v431_v28 }
 0x127   : > { %v851_v31 = vpop.f32.mrf.mxu0 }
 0x128   : > { %869 = vmatmul.mubr.bf16.vlgmr.msra.gmra.mxu1 %v432_v30 }
 0x1e8   : > { %v538_v35 = vpop.f32.mrf.mxu1 }
 0x1e9   : > { %v539_v36 = vadd.f32 %v783_v34, %v538_v35 }
 0x1ea   : > { %v870_v37 = vpop.f32.mrf.mxu1 }
 0x1eb   : > { %v544_v38 = vmax.f32 %v539_v36, 0.0 }
 0x1ec   : > { %v541_v39 = vpop.f32.mrf.mxu1 }
 0x1ed   : > { %v545_v40 = vpack.c.bf16 %v544_v38, %v544_v38 }
 0x1ee   : > { %v871_v41 = vpop.f32.mrf.mxu1 }
 0x1ef   : > { %889 = vmatmul.mubr.bf16.vlgmr.msra.gmra.mxu0 %v545_v40 }
 0x2af   : > { %v651_v43 = vpop.f32.mrf.mxu0 }
 0x2b0   : > { %v652_v44 = vadd.f32 %v792_v42, %v651_v43 }
 0x2b1   : > { %v890_v45 = vpop.f32.mrf.mxu0 }
 0x2b2   : > { %657 = vst [vmem:[%s313_s13] sm:$0xff] %v652_v44 }
 0x2b3   : > { %v654_v46 = vpop.f32.mrf.mxu0 }
 0x2b4   : > { %1081 = shalt.err (!%p1078_p0)
}
 0x2b5   : > { %s1082_s17 = scalar_lea.hbm %s1332_s22, 128  ;;  %s1086_s19 = scalar_lea.hbm %s1380_s7, 256 }
 0x2b6   : > { %p1083_p6 = scmp.ne.s32.totalorder %s1332_s22, %s1082_s17  ;;  %p1087_p1 = scmp.lt.s32.totalorder %s1332_s22, %s1380_s7 }
 0x2b7   : > { %p1088_p5 = scmp.lt.s32.totalorder %s1086_s19, %s1082_s17 }
 0x2b8   : > { %p1084_p9 = pnand %p1083_p6, %p1391_p3 }
 0x2b9   : > { %p1089_p10 = por %p1088_p5, %p1087_p1 }
 0x2ba   : > { %p1085_p13 = pneg %p1084_p9 }
 0x2bc   : > { %p1090_p12 = pnand %p1089_p10, %p1085_p13 }
 0x2be   : > { %1093 = shalt.err (!%p1090_p12)
}
 0x2bf   : > { %904 = dma.vmem_to_hbm [thread:$0]  (%p1391_p3), %s1334_s16, 128, %s1332_s22, %s659_s23   ;;  %v891_v47 = vpop.f32.mrf.mxu0 }
 0x2c0 PF: > { %p926_p2 = scmp.ge.s32.totalorder %s1136_s27, 2  ;;  %s684_s18 = sand.u32 1, %s1124_s24  }
 0x2c1   : > { %p1392_p4 = scmp.ne.s32.totalorder %s1384_s12, 0  ;;  %s685_s20 = scalar_lea.sflag [#allocation4], %s684_s18 }
 0x2c3   : > { %p917_p7 = pnand %p926_p2, %p1392_p4 }
 0x2c5   : > { %p918_p8 = pneg %p917_p7 }
 0x2c7   : > { %1119 = dma.done.wait (%p918_p8), %s685_s20, 128  }
 0x2c8   : > { %1121 = vsyncadd (%p918_p8), %s685_s20, 4294967168  ;;  %p19_p11 = scmp.ge.s32.totalorder %s1211_s30, 4   ;;  %s1393_s24 = smov %s1128_s25 }
 0x2c9   : > { %s1394_s25 = smov %s1132_s26  ;;  %s1395_s26 = smov %s1222_s10 }
 0x2ca   : > { %s1396_s27 = smov %s1211_s30  ;;  %21 = sbr.rel (!%p19_p11) target bundleno = 5 (0x5), region = 96 }
 0x2cf   :  { %690 = vsyncpa [#allocation3], 1 }
 0x2d0   :  { %692 = vsyncpa [#allocation3 + $0x1], 1 }
 0x2d1   :  { %693 = vsyncpa [#allocation6], 1 }
 0x2d2   :  { %694 = vsyncpa [#allocation4], 1 }
 0x2d3   :  { %696 = vsyncpa [#allocation4 + $0x1], 1 }

</bundles_post_ra>
